<compile_context>
chip_gen: v6e
topology: v6e:2x2x1
jax: 0.10.0
libtpu: 0.0.40
codegen_flags: <defaults>
</compile_context>

<pallas_src>
import jax
import jax.numpy as jnp
from jax.experimental import pallas as pl
from jax.experimental.pallas import tpu as pltpu


def masked_linear_kernel(x_ref, w_ref, y_ref, b_ref, o_ref):
    """One row tile of the flattened problem.

    x_ref: (TR, T)    row tile of x reshaped to (B*N, T)
    w_ref: (G*O, T)   masked weight, flattened; constant index map (resident)
    y_ref: (TR, G)    per-row genre mixing weights (row r belongs to batch r // N)
    b_ref: (1, O)     bias
    o_ref: (TR, O)    output row tile
    """
    G = y_ref.shape[1]
    O = b_ref.shape[1]

    # x.float() per module semantics; weight is promoted in-register only.
    x = x_ref[...].astype(jnp.float32)                      # (TR, T)
    w = w_ref[...].astype(jnp.float32)                      # (G*O, T)

    # Single large MXU matmul contracting T: (TR, T) x (T, G*O) -> (TR, G*O).
    z = jax.lax.dot_general(
        x, w,
        dimension_numbers=(((1,), (1,)), ((), ())),
        preferred_element_type=jnp.float32,
    )

    # Genre mix: out[r, o] = sum_g y[r, g] * z[r, g*O + o]   (cheap VPU work).
    y = y_ref[...].astype(jnp.float32)                      # (TR, G)
    acc = y[:, 0:1] * z[:, 0:O]                             # init from g = 0 term
    for g in range(1, G):                                   # G is small, static
        acc = acc + y[:, g:g + 1] * z[:, g * O:(g + 1) * O]

    o_ref[...] = acc + b_ref[...]                           # broadcast (1, O) bias


def masked_linear_univariate(x, y, weight, mask, bias, *, row_tile=512):
    B, N, T = x.shape
    G, O, T2 = weight.shape
    assert T == T2 and mask.shape == (O, T) and y.shape == (B, G)
    assert bias.shape == (O,)

    # Fold the fixed mask into the weight (einsum 'got,ot->got') and flatten:
    # pure parameter prep outside the kernel, eliminates mask DMA + per-step mul.
    mw_flat = (weight * mask[None, :, :].astype(weight.dtype)).reshape(G * O, T)

    x_flat = x.reshape(B * N, T)                            # keep incoming dtype
    y_rows = jnp.repeat(y, N, axis=0)                       # (B*N, G): row r -> batch r // N
    bias2d = bias.reshape(1, O).astype(jnp.float32)

    BN = B * N
    bn8 = ((BN + 7) // 8) * 8                               # sublane-align the row dim
    tr = min(row_tile, bn8)                                 # row tile (multiple of 8)
    num_tiles = -(-bn8 // tr)
    BN_pad = num_tiles * tr
    if BN_pad != BN:
        x_flat = jnp.pad(x_flat, ((0, BN_pad - BN), (0, 0)))
        y_rows = jnp.pad(y_rows, ((0, BN_pad - BN), (0, 0)))

    out_flat = pl.pallas_call(
        masked_linear_kernel,
        out_shape=jax.ShapeDtypeStruct((BN_pad, O), jnp.float32),
        grid_spec=pltpu.PrefetchScalarGridSpec(
            num_scalar_prefetch=0,
            grid=(num_tiles,),
            in_specs=[
                pl.BlockSpec((tr, T), lambda i: (i, 0)),      # x row tile
                pl.BlockSpec((G * O, T), lambda i: (0, 0)),   # masked weight (resident)
                pl.BlockSpec((tr, G), lambda i: (i, 0)),      # per-row genre weights
                pl.BlockSpec((1, O), lambda i: (0, 0)),       # bias (resident)
            ],
            out_specs=pl.BlockSpec((tr, O), lambda i: (i, 0)),
        ),
        compiler_params=pltpu.CompilerParams(
            dimension_semantics=("parallel",),                # v7x: shard row tiles across TCs
            vmem_limit_bytes=32 * 1024 * 1024,                # explicit, safe on v5e/v6e/v7x
        ),
    )(x_flat, mw_flat, y_rows, bias2d)

    return out_flat[:BN].reshape(B, N, O)


def reference(x, y, weight, mask, bias):
    mw = jnp.einsum('got,ot->got', weight, mask)
    gw = jnp.einsum('bg,got->bot', y, mw)
    return jnp.einsum('bnt,bot->bno', x.astype(jnp.float32), gw) + bias


if __name__ == "__main__":
    # Small shapes consistent with the module's forward.
    B, N, T, O, G = 2, 8, 32, 16, 3   # batch, seq, in_features, out_features, num_genres

    key = jax.random.PRNGKey(0)
    k_w, k_b, k_m, k_x, k_y = jax.random.split(key, 5)

    # Deterministic synthetic parameter init (kaiming_uniform-like bounds).
    fan_in = G * T
    w_bound = 1.0 / jnp.sqrt(jnp.float32(T))
    weight = jax.random.uniform(k_w, (G, O, T), jnp.float32, -w_bound, w_bound)
    b_bound = 1.0 / jnp.sqrt(jnp.float32(fan_in))
    bias = jax.random.uniform(k_b, (O,), jnp.float32, -b_bound, b_bound)

    # set_mask: deterministic binary mask of shape (O, T).
    mask = (jax.random.uniform(k_m, (O, T)) > 0.5).astype(jnp.float32)

    # Inputs.
    x = jax.random.normal(k_x, (B, N, T), jnp.float32)
    y = jax.nn.softmax(jax.random.normal(k_y, (B, G), jnp.float32), axis=-1)

    out = masked_linear_univariate(x, y, weight, mask, bias)
    out = jax.block_until_ready(out)

    ref = reference(x, y, weight, mask, bias)
    assert out.shape == (B, N, O)
    assert jnp.allclose(out, ref, atol=1e-5, rtol=1e-5), "mismatch vs reference"

    print("KERNEL_OK")
</pallas_src>

<mosaic_0001>
module attributes {stable_mosaic.version = 11 : i64} {
  func.func @masked_linear_kernel(%arg0: i32, %arg1: memref<16x32xf32, #tpu.memory_space<vmem>>, %arg2: memref<48x32xf32, #tpu.memory_space<vmem>>, %arg3: memref<16x3xf32, #tpu.memory_space<vmem>>, %arg4: memref<1x16xf32, #tpu.memory_space<vmem>>, %arg5: memref<16x16xf32, #tpu.memory_space<vmem>>) attributes {dimension_semantics = [#tpu.dimension_semantics<parallel>], iteration_bounds = array<i64: 1>, scalar_prefetch = 0 : i64, scratch_operands = 0 : i64, tpu.core_type = #tpu.core_type<tc>, window_params = [{transform_indices = @transform_0, window_bounds = array<i64: 16, 32>}, {pipeline_mode = #tpu.pipeline_mode<synchronous>, transform_indices = @transform_1, window_bounds = array<i64: 48, 32>}, {transform_indices = @transform_2, window_bounds = array<i64: 16, 3>}, {pipeline_mode = #tpu.pipeline_mode<synchronous>, transform_indices = @transform_3, window_bounds = array<i64: 1, 16>}, {transform_indices = @transform_4, window_bounds = array<i64: 16, 16>}]} {
    %c0 = arith.constant 0 : index
    %c0_0 = arith.constant 0 : index
    %0 = vector.load %arg1[%c0, %c0_0] : memref<16x32xf32, #tpu.memory_space<vmem>>, vector<16x32xf32>
    %c0_1 = arith.constant 0 : index
    %c0_2 = arith.constant 0 : index
    %1 = vector.load %arg2[%c0_1, %c0_2] : memref<48x32xf32, #tpu.memory_space<vmem>>, vector<48x32xf32>
    %cst = arith.constant dense<0.000000e+00> : vector<16x48xf32>
    %2 = tpu.matmul %0, %1, %cst {dimension_numbers = #tpu.dot_dimension_numbers<[1], [1], [0], [0], [0, 0, 1, 0], [], []>} : vector<16x32xf32>, vector<48x32xf32>, vector<16x48xf32> -> vector<16x48xf32>
    %c0_3 = arith.constant 0 : index
    %c0_4 = arith.constant 0 : index
    %3 = vector.load %arg3[%c0_3, %c0_4] : memref<16x3xf32, #tpu.memory_space<vmem>>, vector<16x3xf32>
    %4 = vector.extract_strided_slice %3 {offsets = [0, 0], sizes = [16, 1], strides = [1, 1]} : vector<16x3xf32> to vector<16x1xf32>
    %5 = vector.extract_strided_slice %2 {offsets = [0, 0], sizes = [16, 16], strides = [1, 1]} : vector<16x48xf32> to vector<16x16xf32>
    %6 = vector.broadcast %4 : vector<16x1xf32> to vector<16x16xf32>
    %7 = arith.mulf %6, %5 : vector<16x16xf32>
    %8 = vector.extract_strided_slice %3 {offsets = [0, 1], sizes = [16, 1], strides = [1, 1]} : vector<16x3xf32> to vector<16x1xf32>
    %9 = vector.extract_strided_slice %2 {offsets = [0, 16], sizes = [16, 16], strides = [1, 1]} : vector<16x48xf32> to vector<16x16xf32>
    %10 = vector.broadcast %8 : vector<16x1xf32> to vector<16x16xf32>
    %11 = arith.mulf %10, %9 : vector<16x16xf32>
    %12 = arith.addf %7, %11 : vector<16x16xf32>
    %13 = vector.extract_strided_slice %3 {offsets = [0, 2], sizes = [16, 1], strides = [1, 1]} : vector<16x3xf32> to vector<16x1xf32>
    %14 = vector.extract_strided_slice %2 {offsets = [0, 32], sizes = [16, 16], strides = [1, 1]} : vector<16x48xf32> to vector<16x16xf32>
    %15 = vector.broadcast %13 : vector<16x1xf32> to vector<16x16xf32>
    %16 = arith.mulf %15, %14 : vector<16x16xf32>
    %17 = arith.addf %12, %16 : vector<16x16xf32>
    %c0_5 = arith.constant 0 : index
    %c0_6 = arith.constant 0 : index
    %18 = vector.load %arg4[%c0_5, %c0_6] : memref<1x16xf32, #tpu.memory_space<vmem>>, vector<1x16xf32>
    %19 = vector.broadcast %18 : vector<1x16xf32> to vector<16x16xf32>
    %20 = arith.addf %17, %19 : vector<16x16xf32>
    %c0_7 = arith.constant 0 : index
    %c0_8 = arith.constant 0 : index
    %21 = vector.load %arg5[%c0_7, %c0_8] : memref<16x16xf32, #tpu.memory_space<vmem>>, vector<16x16xf32>
    tpu.vector_store %arg5[%c0_7, %c0_8], %20 {strides = array<i32>} : memref<16x16xf32, #tpu.memory_space<vmem>>, vector<16x16xf32>,
    return
  }
  func.func @transform_0(%arg0: i32) -> (i32, i32) {
    %c0_i32 = arith.constant 0 : i32
    %c0_i32_0 = arith.constant 0 : i32
    return %arg0, %c0_i32 : i32, i32
  }
  func.func @transform_1(%arg0: i32) -> (i32, i32) {
    %c0_i32 = arith.constant 0 : i32
    %c0_i32_0 = arith.constant 0 : i32
    %c0_i32_1 = arith.constant 0 : i32
    return %c0_i32, %c0_i32_0 : i32, i32
  }
  func.func @transform_2(%arg0: i32) -> (i32, i32) {
    %c0_i32 = arith.constant 0 : i32
    %c0_i32_0 = arith.constant 0 : i32
    return %arg0, %c0_i32 : i32, i32
  }
  func.func @transform_3(%arg0: i32) -> (i32, i32) {
    %c0_i32 = arith.constant 0 : i32
    %c0_i32_0 = arith.constant 0 : i32
    %c0_i32_1 = arith.constant 0 : i32
    return %c0_i32, %c0_i32_0 : i32, i32
  }
  func.func @transform_4(%arg0: i32) -> (i32, i32) {
    %c0_i32 = arith.constant 0 : i32
    %c0_i32_0 = arith.constant 0 : i32
    return %arg0, %c0_i32 : i32, i32
  }
}

</mosaic_0001>

<bundles_post_ra>
// kernel: tpu_custom_call.1
= control target key start
LH: loop header
LB: loop body
LE: loop exit
PB: predicated region body
PF: predicated region fallthrough
CT: control target
= control target key end

     0   :  { %vm26_vm0 = vcmask 261120   ;;  %v275_v2 = vmov 2   ;;  %v276_v5 = vmov 1   ;;  %s358_s0 = inlined_call_operand.vmem [shape: f32[16,32], index: 0, kind: input, shape index: {}]   ;;  %s359_s1 = inlined_call_operand.vmem [shape: f32[48,32], index: 1, kind: input, shape index: {}]   ;;  %s360_s2 = inlined_call_operand.vmem [shape: f32[16,3], index: 2, kind: input, shape index: {}]   ;;  %s361_s3 = inlined_call_operand.vmem [shape: f32[1,16], index: 3, kind: input, shape index: {}]   ;;  %s362_s4 = inlined_call_operand.hbm [shape: f32[16,16], index: 4, kind: output, shape index: {}]  }
   0x1   :  { %v25_v0 = vld [vmem:[%s359_s1 + $0x28] sm:$0xff]  ;;  %v24_v1 = vld [vmem:[%s359_s1 + $0x20] sm:$0xff]  ;;  %249 = vset.pattern.permute.xlu1 %v275_v2  ;;  %248 = vset.pattern.permute.xlu0 %v276_v5 }
   0x2   :  { %225 = vmatprep.subr.msk.mxu0 %vm26_vm0, %v25_v0  ;;  %v18_v3 = vld [vmem:[%s358_s0] sm:$0xff] }
   0x3   :  { %226 = vmatpush3.xpose.msk.msra.mxu0 %vm26_vm0, %v25_v0  ;;  %v126_v4 = vld [vmem:[%s360_s2] sm:$0xff]  ;;  %237 = vmatprep.mubr.msk.f32.mxu0 %vm26_vm0, %v18_v3 }
   0x4   :  { %227 = vmatprep.subr.msk.mxu0 %vm26_vm0, %v24_v1 }
   0x5   :  { %9 = vsyncpa [#allocation3], 0  ;;  %v23_v6 = vld [vmem:[%s359_s1 + $0x18] sm:$0xff]  ;;  %161 = vperm.xlu1 %249, %v126_v4   ;;  %141 = vperm.xlu0 %248, %v126_v4   ;;  %v127_v7 = vld [vmem:[%s360_s2 + $0x8] sm:$0xff]  ;;  %v277_v10 = vmov 0   ;;  %s279_s8 = smov 96  }
   0x6   :  { %v22_v8 = vld [vmem:[%s359_s1 + $0x10] sm:$0xff]  ;;  %v21_v9 = vld [vmem:[%s359_s1 + $0x8] sm:$0xff]  ;;  %v20_v11 = vld [vmem:[%s359_s1] sm:$0xff]  ;;  %s278_s1 = smov 112   ;;  %s280_s10 = smov [#allocation2]   ;;  %vm189_vm1 = vcmask 130048  }
   0x7   :  { %228 = vmatpush3.xpose.msk.msra.mxu0 %vm26_vm0, %v24_v1  ;;  %v19_v12 = vld [vmem:[%s358_s0 + $0x8] sm:$0xff]  ;;  %v216_v30 = vld [vmem:[%s361_s3] ss:$0 sm:$0xff]  ;;  %s197_s11 = sshll.u32 %s280_s10, 4  ;;  %s198_s11 = int_to_ptr.vmem [resolvable:$true] %s197_s11 }
   0x8   :  { %229 = vmatprep.subr.msk.mxu0 %vm26_vm0, %v23_v6  ;;  %s253_s12 = scalar_lea.vmem %s198_s11, 256  ;;  %p258_p1 = scmp.lt.s32.totalorder %s198_s11, %s198_s11 }
   0x9   :  { %165 = vperm.xlu1 %249, %v127_v7   ;;  %145 = vperm.xlu0 %248, %v127_v7   ;;  %p254_p0 = scmp.ne.s32.totalorder %s198_s11, %s253_s12  ;;  %p259_p2 = scmp.lt.s32.totalorder %s253_s12, %s253_s12 }
   0xb   :  { %230 = vmatpush3.xpose.msk.msra.mxu0 %vm26_vm0, %v23_v6  ;;  %p260_p3 = por %p259_p2, %p258_p1 }
   0xc   :  { %231 = vmatprep.subr.msk.mxu0 %vm26_vm0, %v22_v8 }
   0xd   :  { %251 = vset.pattern.permute.xlu1 %v277_v10  ;;  %250 = vset.pattern.permute.xlu0 %v277_v10  ;;  %p261_p4 = pnand %p260_p3, %p254_p0 }
   0xe   :  { %135 = vperm.xlu1 %251, %v127_v7   ;;  %130 = vperm.xlu0 %250, %v126_v4  }
   0xf   :  { %232 = vmatpush3.xpose.msk.msra.mxu0 %vm26_vm0, %v22_v8 }
  0x10   :  { %233 = vmatprep.subr.msk.mxu0 %vm26_vm0, %v21_v9 }
  0x12   :  { %252 = vset.pattern.permute.xlu0 %v275_v2 }
  0x13   :  { %234 = vmatpush3.xpose.msk.msra.mxu0 %vm26_vm0, %v21_v9 }
  0x14   :  { %235 = vmatprep.subr.msk.mxu0 %vm26_vm0, %v20_v11 }
  0x17   :  { %236 = vmatpush3.xpose.msk.msra.mxu0 %vm26_vm0, %v20_v11 }
  0x1a   :  { %238 = vmatmul.mubr.msk.f32.vlgmr.msra.gmra.mxu0 %vm26_vm0, %v19_v12 }
  0x80   :  { %v142_v13 = vpop.permute.xlu0 %141  ;;  %v162_v14 = vpop.permute.xlu1 %161 }
  0x84   :  { %v146_v15 = vpop.permute.xlu0 %145  ;;  %v166_v20 = vpop.permute.xlu1 %165 }
  0x89   :  { %v131_v23 = vpop.permute.xlu0 %130  ;;  %v136_v24 = vpop.permute.xlu1 %135 }
  0xda   :  { %v239_v16 = vpop.f32.mrf.mxu0 }
  0xdb   :  { %v149_v17 = vmul.f32 %v239_v16, %v146_v15  ;;  %v169_v21 = vmul.f32 %v239_v16, %v166_v20  ;;  %v139_v26 = vmul.f32 %v239_v16, %v136_v24 }
  0xdc   :  { %v117_v18 = vpop.f32.mrf.mxu0 }
  0xdd   :  { %v148_v19 = vmul.f32 %v142_v13, %v117_v18  ;;  %154 = vrot.lane.b32.xlu0 %v149_v17, %s278_s1  ;;  %v168_v22 = vmul.f32 %v162_v14, %v117_v18  ;;  %v138_v28 = vmul.f32 %v131_v23, %v117_v18 }
  0xdf   :  { %152 = vrot.lane.b32.xlu1 %v148_v19, %s278_s1 }
  0xe1   :  { %174 = vrot.lane.b32.xlu0 %v169_v21, %s279_s8 }
  0xe3   :  { %172 = vrot.lane.b32.xlu1 %v168_v22, %s279_s8 }
 0x14f   :  { %v155_v25 = vpop.permute.xlu0 %154 }
 0x150   :  { %v159_v29 = vadd.f32 %v155_v25, %v139_v26 }
 0x151   :  { %v153_v27 = vpop.permute.xlu1 %152 }
 0x152   :  { %v158_v32 = vadd.f32 %v153_v27, %v138_v28 }
 0x153   :  { %v175_v31 = vpop.permute.xlu0 %174 }
 0x154   :  { %v179_v33 = vadd.f32 %v175_v31, %v159_v29 }
 0x155   :  { %v173_v34 = vpop.permute.xlu1 %172 }
 0x156   :  { %v188_v35 = vadd.f32 %v216_v30, %v179_v33  ;;  %v178_v36 = vadd.f32 %v173_v34, %v158_v32 }
 0x158   :  { %191 = vst.msk [vmem:[#allocation2 + $0x8] sm:$0xff] %vm189_vm1, %v188_v35  ;;  %v187_v37 = vadd.f32 %v216_v30, %v178_v36 }
 0x15a   :  { %190 = vst.msk [vmem:[#allocation2] sm:$0xff] %vm189_vm1, %v187_v37 }
 0x15b   :  { %264 = shalt.err (!%p261_p4)
}
 0x15c   :  { %s281_s3 = smov 128   ;;  %s282_s13 = smov 8  }
 0x15d   :  { %203 = dma.vmem_to_hbm [thread:$0]  %s198_s11, 256, %s362_s4, [#allocation3], %s281_s3, %s281_s3, %s282_s13  }
 0x15e   :  { %273 = dma.done.wait [#allocation3], 256  }
 0x15f   :  { %274 = vsyncadd [#allocation3], 4294967040 }
 0x160   :  { %207 = vsyncpa [#allocation3], 1 }

</bundles_post_ra>
